<compile_context>
chip_gen: v5e
topology: v5e:2x2
jax: 0.10.0
libtpu: 0.0.40
codegen_flags: <defaults>
</compile_context>

<pallas_src>
import math
import jax
import jax.numpy as jnp
from jax import lax
from jax.experimental import pallas as pl
from jax.experimental.pallas import tpu as pltpu


def _mha_kernel(q_ref, k_ref, v_ref, wq_ref, wk_ref, wv_ref, wo_ref,
                o_ref, attn_ref, acc_ref, kh_cache, vh_cache):
    """One grid step = (batch b, query-tile qt, head h).

    Ref shapes (leading size-1 dims squeezed away by the BlockSpecs):
      q_ref    : (TQ, D)      f32    query tile
      k_ref    : (S,  D)      f32    full keys for this batch element
      v_ref    : (S,  D)      f32    full values for this batch element
      wq_ref   : (D, hd)      bf16   per-head Q weight slice (softmax scale pre-folded)
      wk_ref   : (D, hd)      bf16
      wv_ref   : (D, hd)      bf16
      wo_ref   : (hd, D)      bf16   per-head output-projection slice
      o_ref    : (TQ, D)      f32    output tile (written once, on the last head)
      attn_ref : (TQ, S)             attention probabilities for this (b, h, qt)
      acc_ref  : (TQ, D)      f32    VMEM scratch accumulator across heads
      kh_cache : (H, S, hd)   bf16   per-head projected keys, reused across query tiles
      vh_cache : (H, S, hd)   bf16   per-head projected values, reused across query tiles
    """
    qt = pl.program_id(1)
    h = pl.program_id(2)

    @pl.when(h == 0)
    def _():
        acc_ref[...] = jnp.zeros_like(acc_ref)

    # K/V projection for this head: compute only on the first query tile of each batch
    # element and cache.  qt is a sequential ("arbitrary") grid axis, so any core that
    # executes qt > 0 has already executed qt == 0 for the same b.
    @pl.when(qt == 0)
    def _():
        k = k_ref[...].astype(jnp.bfloat16)
        v = v_ref[...].astype(jnp.bfloat16)
        kh = jnp.dot(k, wk_ref[...], preferred_element_type=jnp.float32)   # (S, hd)
        vh = jnp.dot(v, wv_ref[...], preferred_element_type=jnp.float32)   # (S, hd)
        kh_cache[h] = kh.astype(kh_cache.dtype)
        vh_cache[h] = vh.astype(vh_cache.dtype)

    # Q projection for this (tile, head); bf16 MXU inputs, f32 accumulation.
    q = q_ref[...].astype(jnp.bfloat16)
    qh = jnp.dot(q, wq_ref[...], preferred_element_type=jnp.float32)       # (TQ, hd)

    kh = kh_cache[h]                                                        # (S, hd) bf16
    vh = vh_cache[h]                                                        # (S, hd) bf16

    # scores = Qh @ Kh^T without materializing a transpose: contract last dims.
    scores = lax.dot_general(
        qh.astype(jnp.bfloat16), kh,
        dimension_numbers=(((1,), (1,)), ((), ())),
        preferred_element_type=jnp.float32)                                 # (TQ, S)

    # numerically-stable softmax; reciprocal goes to the EUP slot (VPU relief).
    m = jnp.max(scores, axis=-1, keepdims=True)
    e = jnp.exp(scores - m)
    denom = jnp.sum(e, axis=-1, keepdims=True)
    p = e * pl.reciprocal(denom, approx=True)                               # (TQ, S)

    attn_ref[...] = p.astype(attn_ref.dtype)

    ctx = jnp.dot(p.astype(jnp.bfloat16), vh,
                  preferred_element_type=jnp.float32)                       # (TQ, hd)

    # Per-head contribution to the output projection (replaces the head concat).
    acc_ref[...] += jnp.dot(ctx.astype(jnp.bfloat16), wo_ref[...],
                            preferred_element_type=jnp.float32)             # (TQ, D)

    @pl.when(h == pl.num_programs(2) - 1)
    def _():
        o_ref[...] = acc_ref[...].astype(o_ref.dtype)


def _pick_block_q(S):
    """Largest divisor of S that is <= 256 (keeps VMEM bounded for long sequences)."""
    for cand in (256, 128, 64, 32, 16, 8):
        if S % cand == 0:
            return cand
    return S


def multi_head_attention(query, key, value, wq, wk, wv, wo, *, n_heads,
                         block_q=None, attn_dtype=jnp.float32):
    """query/key/value: (B, S, D) float32.  w*: PyTorch-style (out, in) weights.

    Returns (output (B, S, D) f32, attention (B, H, S, S) attn_dtype).
    """
    B, S, D = query.shape
    assert D % n_heads == 0
    hd = D // n_heads
    inv_scale = 1.0 / math.sqrt(hd)

    if block_q is None:
        block_q = _pick_block_q(S)
    if S % block_q != 0:
        block_q = S
    n_qt = S // block_q

    # nn.Linear (bias=False) does y = x @ W.T -> pre-transpose to (in, out),
    # fold 1/sqrt(head_dim) into Wq, split per head, and cast to bf16 MXU inputs.
    wq_h = (wq.T * inv_scale).reshape(D, n_heads, hd).transpose(1, 0, 2).astype(jnp.bfloat16)
    wk_h = wk.T.reshape(D, n_heads, hd).transpose(1, 0, 2).astype(jnp.bfloat16)   # (H, D, hd)
    wv_h = wv.T.reshape(D, n_heads, hd).transpose(1, 0, 2).astype(jnp.bfloat16)   # (H, D, hd)
    wo_h = wo.T.reshape(n_heads, hd, D).astype(jnp.bfloat16)                      # (H, hd, D)

    grid = (B, n_qt, n_heads)

    q_spec = pl.BlockSpec((None, block_q, D), lambda b, qt, h: (b, qt, 0))
    kv_spec = pl.BlockSpec((None, S, D), lambda b, qt, h: (b, 0, 0))
    w_in_spec = pl.BlockSpec((None, D, hd), lambda b, qt, h: (h, 0, 0))
    w_out_spec = pl.BlockSpec((None, hd, D), lambda b, qt, h: (h, 0, 0))
    o_spec = pl.BlockSpec((None, block_q, D), lambda b, qt, h: (b, qt, 0))
    attn_spec = pl.BlockSpec((None, None, block_q, S), lambda b, qt, h: (b, h, qt, 0))

    out_shapes = (
        jax.ShapeDtypeStruct((B, S, D), jnp.float32),             # output
        jax.ShapeDtypeStruct((B, n_heads, S, S), attn_dtype),     # attention probs
    )

    flops = 8 * B * S * D * D + 4 * B * S * S * D
    transcendentals = B * n_heads * S * S
    bytes_accessed = (3 * B * S * D * 4            # q/k/v reads (f32)
                      + 4 * D * D * 2              # bf16 weights
                      + B * S * D * 4              # output
                      + B * n_heads * S * S * jnp.dtype(attn_dtype).itemsize)

    return pl.pallas_call(
        _mha_kernel,
        out_shape=out_shapes,
        grid_spec=pltpu.PrefetchScalarGridSpec(
            num_scalar_prefetch=0,
            grid=grid,
            in_specs=[q_spec, kv_spec, kv_spec,
                      w_in_spec, w_in_spec, w_in_spec, w_out_spec],
            out_specs=[o_spec, attn_spec],
            scratch_shapes=[
                pltpu.VMEM((block_q, D), jnp.float32),          # head accumulator
                pltpu.VMEM((n_heads, S, hd), jnp.bfloat16),     # cached K projections
                pltpu.VMEM((n_heads, S, hd), jnp.bfloat16),     # cached V projections
            ],
        ),
        compiler_params=pltpu.CompilerParams(
            # batch is megacore-parallel; qt/heads stay sequential so the K/V projection
            # cache (filled at qt == 0) is always valid for qt > 0 on the same core.
            dimension_semantics=("parallel", "arbitrary", "arbitrary"),
            vmem_limit_bytes=64 * 1024 * 1024,
        ),
        cost_estimate=pl.CostEstimate(
            flops=flops,
            transcendentals=transcendentals,
            bytes_accessed=bytes_accessed),
    )(query, key, value, wq_h, wk_h, wv_h, wo_h)


def _reference(query, key, value, wq, wk, wv, wo, *, n_heads):
    B, S, D = query.shape
    hd = D // n_heads
    Q = query @ wq.T
    K = key @ wk.T
    V = value @ wv.T
    Q = Q.reshape(B, S, n_heads, hd).transpose(0, 2, 1, 3)
    K = K.reshape(B, S, n_heads, hd).transpose(0, 2, 1, 3)
    V = V.reshape(B, S, n_heads, hd).transpose(0, 2, 1, 3)
    scores = jnp.einsum("bhqd,bhkd->bhqk", Q, K) / jnp.sqrt(jnp.float32(hd))
    attn = jax.nn.softmax(scores, axis=-1)
    ctx = jnp.einsum("bhqk,bhkd->bhqd", attn, V)
    ctx = ctx.transpose(0, 2, 1, 3).reshape(B, S, D)
    return ctx @ wo.T, attn


if __name__ == "__main__":
    batch, seq_len, hid_dim, n_heads = 2, 8, 32, 2

    key0 = jax.random.PRNGKey(0)
    kq, kk, kv, k1, k2, k3, k4 = jax.random.split(key0, 7)

    query = jax.random.normal(kq, (batch, seq_len, hid_dim), dtype=jnp.float32)
    key_in = jax.random.normal(kk, (batch, seq_len, hid_dim), dtype=jnp.float32)
    value = jax.random.normal(kv, (batch, seq_len, hid_dim), dtype=jnp.float32)

    # deterministic synthetic weights, PyTorch Linear shape (out_features, in_features)
    init_scale = 1.0 / math.sqrt(hid_dim)
    wq = jax.random.uniform(k1, (hid_dim, hid_dim), jnp.float32, -init_scale, init_scale)
    wk = jax.random.uniform(k2, (hid_dim, hid_dim), jnp.float32, -init_scale, init_scale)
    wv = jax.random.uniform(k3, (hid_dim, hid_dim), jnp.float32, -init_scale, init_scale)
    wo = jax.random.uniform(k4, (hid_dim, hid_dim), jnp.float32, -init_scale, init_scale)

    out, attn = multi_head_attention(query, key_in, value, wq, wk, wv, wo,
                                     n_heads=n_heads)
    jax.block_until_ready((out, attn))

    ref_out, ref_attn = _reference(query, key_in, value, wq, wk, wv, wo,
                                   n_heads=n_heads)

    # bf16 MXU inputs (f32 accumulation) -> loosened tolerances vs the f32 reference.
    assert jnp.allclose(out, ref_out, atol=5e-2, rtol=5e-2), (
        "output mismatch, max abs diff = %s" % jnp.max(jnp.abs(out - ref_out)))
    assert jnp.allclose(attn.astype(jnp.float32), ref_attn, atol=2e-2, rtol=2e-2), (
        "attention mismatch, max abs diff = %s"
        % jnp.max(jnp.abs(attn.astype(jnp.float32) - ref_attn)))

    print("KERNEL_OK")
</pallas_src>

<mosaic_0001>
module attributes {stable_mosaic.version = 11 : i64} {
  func.func @_mha_kernel(%arg0: i32, %arg1: i32, %arg2: i32, %arg3: memref<1x8x32xf32, #tpu.memory_space<vmem>>, %arg4: memref<1x8x32xf32, #tpu.memory_space<vmem>>, %arg5: memref<1x8x32xf32, #tpu.memory_space<vmem>>, %arg6: memref<1x32x16xbf16, #tpu.memory_space<vmem>>, %arg7: memref<1x32x16xbf16, #tpu.memory_space<vmem>>, %arg8: memref<1x32x16xbf16, #tpu.memory_space<vmem>>, %arg9: memref<1x16x32xbf16, #tpu.memory_space<vmem>>, %arg10: memref<1x8x32xf32, #tpu.memory_space<vmem>>, %arg11: memref<1x1x8x8xf32, #tpu.memory_space<vmem>>, %arg12: memref<8x32xf32, #tpu.memory_space<vmem>>, %arg13: memref<2x8x16xbf16, #tpu.memory_space<vmem>>, %arg14: memref<2x8x16xbf16, #tpu.memory_space<vmem>>) attributes {dimension_semantics = [#tpu.dimension_semantics<parallel>, #tpu.dimension_semantics<arbitrary>, #tpu.dimension_semantics<arbitrary>], iteration_bounds = array<i64: 2, 1, 2>, scalar_prefetch = 0 : i64, scratch_operands = 3 : i64, tpu.core_type = #tpu.core_type<tc>, window_params = [{transform_indices = @transform_0, window_bounds = array<i64: 1, 8, 32>}, {transform_indices = @transform_1, window_bounds = array<i64: 1, 8, 32>}, {transform_indices = @transform_2, window_bounds = array<i64: 1, 8, 32>}, {transform_indices = @transform_3, window_bounds = array<i64: 1, 32, 16>}, {transform_indices = @transform_4, window_bounds = array<i64: 1, 32, 16>}, {transform_indices = @transform_5, window_bounds = array<i64: 1, 32, 16>}, {transform_indices = @transform_6, window_bounds = array<i64: 1, 16, 32>}, {transform_indices = @transform_7, window_bounds = array<i64: 1, 8, 32>}, {transform_indices = @transform_8, window_bounds = array<i64: 1, 1, 8, 8>}]} {
    %c0_i32 = arith.constant 0 : i32
    %0 = arith.cmpi eq, %arg2, %c0_i32 : i32
    %1 = arith.extui %0 : i1 to i32
    %c0_i32_0 = arith.constant 0 : i32
    %2 = arith.cmpi ne, %1, %c0_i32_0 : i32
    scf.if %2 {
      %cst_29 = arith.constant 0.000000e+00 : f32
      %45 = vector.broadcast %cst_29 : f32 to vector<8x32xf32>
      %c0_30 = arith.constant 0 : index
      %c0_31 = arith.constant 0 : index
      %46 = vector.load %arg12[%c0_30, %c0_31] : memref<8x32xf32, #tpu.memory_space<vmem>>, vector<8x32xf32>
      tpu.vector_store %arg12[%c0_30, %c0_31], %45 {strides = array<i32>} : memref<8x32xf32, #tpu.memory_space<vmem>>, vector<8x32xf32>,
    } else {
    }
    %c0_i32_1 = arith.constant 0 : i32
    %3 = arith.cmpi eq, %arg1, %c0_i32_1 : i32
    %4 = arith.extui %3 : i1 to i32
    %c0_i32_2 = arith.constant 0 : i32
    %5 = arith.cmpi ne, %4, %c0_i32_2 : i32
    scf.if %5 {
      %c0_29 = arith.constant 0 : index
      %c0_30 = arith.constant 0 : index
      %c0_31 = arith.constant 0 : index
      %45 = vector.load %arg4[%c0_29, %c0_30, %c0_31] : memref<1x8x32xf32, #tpu.memory_space<vmem>>, vector<1x8x32xf32>
      %46 = vector.shape_cast %45 : vector<1x8x32xf32> to vector<8x32xf32>
      %47 = arith.truncf %46 : vector<8x32xf32> to vector<8x32xbf16>
      %c0_32 = arith.constant 0 : index
      %c0_33 = arith.constant 0 : index
      %c0_34 = arith.constant 0 : index
      %48 = vector.load %arg5[%c0_32, %c0_33, %c0_34] : memref<1x8x32xf32, #tpu.memory_space<vmem>>, vector<1x8x32xf32>
      %49 = vector.shape_cast %48 : vector<1x8x32xf32> to vector<8x32xf32>
      %50 = arith.truncf %49 : vector<8x32xf32> to vector<8x32xbf16>
      %c0_35 = arith.constant 0 : index
      %c0_36 = arith.constant 0 : index
      %c0_37 = arith.constant 0 : index
      %51 = vector.load %arg7[%c0_35, %c0_36, %c0_37] : memref<1x32x16xbf16, #tpu.memory_space<vmem>>, vector<1x32x16xbf16>
      %52 = vector.shape_cast %51 : vector<1x32x16xbf16> to vector<32x16xbf16>
      %cst_38 = arith.constant dense<0.000000e+00> : vector<8x16xf32>
      %53 = tpu.matmul %47, %52, %cst_38 {dimension_numbers = #tpu.dot_dimension_numbers<[1], [0], [0], [1], [0, 0, 1, 1], [], []>} : vector<8x32xbf16>, vector<32x16xbf16>, vector<8x16xf32> -> vector<8x16xf32>
      %c0_39 = arith.constant 0 : index
      %c0_40 = arith.constant 0 : index
      %c0_41 = arith.constant 0 : index
      %54 = vector.load %arg8[%c0_39, %c0_40, %c0_41] : memref<1x32x16xbf16, #tpu.memory_space<vmem>>, vector<1x32x16xbf16>
      %55 = vector.shape_cast %54 : vector<1x32x16xbf16> to vector<32x16xbf16>
      %cst_42 = arith.constant dense<0.000000e+00> : vector<8x16xf32>
      %56 = tpu.matmul %50, %55, %cst_42 {dimension_numbers = #tpu.dot_dimension_numbers<[1], [0], [0], [1], [0, 0, 1, 1], [], []>} : vector<8x32xbf16>, vector<32x16xbf16>, vector<8x16xf32> -> vector<8x16xf32>
      %57 = arith.truncf %53 : vector<8x16xf32> to vector<8x16xbf16>
      %58 = arith.index_cast %arg2 : i32 to index
      %c0_43 = arith.constant 0 : index
      %c0_44 = arith.constant 0 : index
      %59 = vector.load %arg13[%58, %c0_43, %c0_44] : memref<2x8x16xbf16, #tpu.memory_space<vmem>>, vector<1x8x16xbf16>
      %60 = vector.shape_cast %59 : vector<1x8x16xbf16> to vector<8x16xbf16>
      %61 = vector.shape_cast %57 : vector<8x16xbf16> to vector<1x8x16xbf16>
      tpu.vector_store %arg13[%58, %c0_43, %c0_44], %61 {strides = array<i32>} : memref<2x8x16xbf16, #tpu.memory_space<vmem>>, vector<1x8x16xbf16>,
      %62 = arith.truncf %56 : vector<8x16xf32> to vector<8x16xbf16>
      %63 = arith.index_cast %arg2 : i32 to index
      %c0_45 = arith.constant 0 : index
      %c0_46 = arith.constant 0 : index
      %64 = vector.load %arg14[%63, %c0_45, %c0_46] : memref<2x8x16xbf16, #tpu.memory_space<vmem>>, vector<1x8x16xbf16>
      %65 = vector.shape_cast %64 : vector<1x8x16xbf16> to vector<8x16xbf16>
      %66 = vector.shape_cast %62 : vector<8x16xbf16> to vector<1x8x16xbf16>
      tpu.vector_store %arg14[%63, %c0_45, %c0_46], %66 {strides = array<i32>} : memref<2x8x16xbf16, #tpu.memory_space<vmem>>, vector<1x8x16xbf16>,
    } else {
    }
    %c0 = arith.constant 0 : index
    %c0_3 = arith.constant 0 : index
    %c0_4 = arith.constant 0 : index
    %6 = vector.load %arg3[%c0, %c0_3, %c0_4] : memref<1x8x32xf32, #tpu.memory_space<vmem>>, vector<1x8x32xf32>
    %7 = vector.shape_cast %6 : vector<1x8x32xf32> to vector<8x32xf32>
    %8 = arith.truncf %7 : vector<8x32xf32> to vector<8x32xbf16>
    %c0_5 = arith.constant 0 : index
    %c0_6 = arith.constant 0 : index
    %c0_7 = arith.constant 0 : index
    %9 = vector.load %arg6[%c0_5, %c0_6, %c0_7] : memref<1x32x16xbf16, #tpu.memory_space<vmem>>, vector<1x32x16xbf16>
    %10 = vector.shape_cast %9 : vector<1x32x16xbf16> to vector<32x16xbf16>
    %cst = arith.constant dense<0.000000e+00> : vector<8x16xf32>
    %11 = tpu.matmul %8, %10, %cst {dimension_numbers = #tpu.dot_dimension_numbers<[1], [0], [0], [1], [0, 0, 1, 1], [], []>} : vector<8x32xbf16>, vector<32x16xbf16>, vector<8x16xf32> -> vector<8x16xf32>
    %12 = arith.index_cast %arg2 : i32 to index
    %c0_8 = arith.constant 0 : index
    %c0_9 = arith.constant 0 : index
    %13 = vector.load %arg13[%12, %c0_8, %c0_9] : memref<2x8x16xbf16, #tpu.memory_space<vmem>>, vector<1x8x16xbf16>
    %14 = vector.shape_cast %13 : vector<1x8x16xbf16> to vector<8x16xbf16>
    %15 = arith.index_cast %arg2 : i32 to index
    %c0_10 = arith.constant 0 : index
    %c0_11 = arith.constant 0 : index
    %16 = vector.load %arg14[%15, %c0_10, %c0_11] : memref<2x8x16xbf16, #tpu.memory_space<vmem>>, vector<1x8x16xbf16>
    %17 = vector.shape_cast %16 : vector<1x8x16xbf16> to vector<8x16xbf16>
    %18 = arith.truncf %11 : vector<8x16xf32> to vector<8x16xbf16>
    %cst_12 = arith.constant dense<0.000000e+00> : vector<8x8xf32>
    %19 = tpu.matmul %18, %14, %cst_12 {dimension_numbers = #tpu.dot_dimension_numbers<[1], [1], [0], [0], [0, 0, 1, 0], [], []>} : vector<8x16xbf16>, vector<8x16xbf16>, vector<8x8xf32> -> vector<8x8xf32>
    %cst_13 = arith.constant dense<0xFF800000> : vector<8xf32>
    %20 = vector.multi_reduction <maximumf>, %19, %cst_13 [1] : vector<8x8xf32> to vector<8xf32>
    %21 = vector.shape_cast %20 : vector<8xf32> to vector<8x1xf32>
    %22 = vector.broadcast %21 : vector<8x1xf32> to vector<8x8xf32>
    %23 = arith.subf %19, %22 : vector<8x8xf32>
    %24 = math.exp %23 : vector<8x8xf32>
    %cst_14 = arith.constant dense<0.000000e+00> : vector<8xf32>
    %25 = vector.multi_reduction <add>, %24, %cst_14 [1] : vector<8x8xf32> to vector<8xf32>
    %26 = vector.shape_cast %25 : vector<8xf32> to vector<8x1xf32>
    %27 = tpu.reciprocal %26 {approx = true} : vector<8x1xf32> -> vector<8x1xf32>
    %28 = vector.broadcast %27 : vector<8x1xf32> to vector<8x8xf32>
    %29 = arith.mulf %24, %28 : vector<8x8xf32>
    %c0_15 = arith.constant 0 : index
    %c0_16 = arith.constant 0 : index
    %c0_17 = arith.constant 0 : index
    %c0_18 = arith.constant 0 : index
    %30 = vector.load %arg11[%c0_15, %c0_16, %c0_17, %c0_18] : memref<1x1x8x8xf32, #tpu.memory_space<vmem>>, vector<1x1x8x8xf32>
    %31 = vector.shape_cast %30 : vector<1x1x8x8xf32> to vector<8x8xf32>
    %32 = vector.shape_cast %29 : vector<8x8xf32> to vector<1x1x8x8xf32>
    tpu.vector_store %arg11[%c0_15, %c0_16, %c0_17, %c0_18], %32 {strides = array<i32>} : memref<1x1x8x8xf32, #tpu.memory_space<vmem>>, vector<1x1x8x8xf32>,
    %33 = arith.truncf %29 : vector<8x8xf32> to vector<8x8xbf16>
    %cst_19 = arith.constant dense<0.000000e+00> : vector<8x16xf32>
    %34 = tpu.matmul %33, %17, %cst_19 {dimension_numbers = #tpu.dot_dimension_numbers<[1], [0], [0], [1], [0, 0, 1, 1], [], []>} : vector<8x8xbf16>, vector<8x16xbf16>, vector<8x16xf32> -> vector<8x16xf32>
    %c0_20 = arith.constant 0 : index
    %c0_21 = arith.constant 0 : index
    %35 = vector.load %arg12[%c0_20, %c0_21] : memref<8x32xf32, #tpu.memory_space<vmem>>, vector<8x32xf32>
    %36 = arith.truncf %34 : vector<8x16xf32> to vector<8x16xbf16>
    %c0_22 = arith.constant 0 : index
    %c0_23 = arith.constant 0 : index
    %c0_24 = arith.constant 0 : index
    %37 = vector.load %arg9[%c0_22, %c0_23, %c0_24] : memref<1x16x32xbf16, #tpu.memory_space<vmem>>, vector<1x16x32xbf16>
    %38 = vector.shape_cast %37 : vector<1x16x32xbf16> to vector<16x32xbf16>
    %cst_25 = arith.constant dense<0.000000e+00> : vector<8x32xf32>
    %39 = tpu.matmul %36, %38, %cst_25 {dimension_numbers = #tpu.dot_dimension_numbers<[1], [0], [0], [1], [0, 0, 1, 1], [], []>} : vector<8x16xbf16>, vector<16x32xbf16>, vector<8x32xf32> -> vector<8x32xf32>
    %40 = arith.addf %35, %39 : vector<8x32xf32>
    %c0_26 = arith.constant 0 : index
    %c0_27 = arith.constant 0 : index
    %41 = vector.load %arg12[%c0_26, %c0_27] : memref<8x32xf32, #tpu.memory_space<vmem>>, vector<8x32xf32>
    tpu.vector_store %arg12[%c0_26, %c0_27], %40 {strides = array<i32>} : memref<8x32xf32, #tpu.memory_space<vmem>>, vector<8x32xf32>,
    %c1_i32 = arith.constant 1 : i32
    %42 = arith.cmpi eq, %arg2, %c1_i32 : i32
    %43 = arith.extui %42 : i1 to i32
    %c0_i32_28 = arith.constant 0 : i32
    %44 = arith.cmpi ne, %43, %c0_i32_28 : i32
    scf.if %44 {
      %c0_29 = arith.constant 0 : index
      %c0_30 = arith.constant 0 : index
      %45 = vector.load %arg12[%c0_29, %c0_30] : memref<8x32xf32, #tpu.memory_space<vmem>>, vector<8x32xf32>
      %c0_31 = arith.constant 0 : index
      %c0_32 = arith.constant 0 : index
      %c0_33 = arith.constant 0 : index
      %46 = vector.load %arg10[%c0_31, %c0_32, %c0_33] : memref<1x8x32xf32, #tpu.memory_space<vmem>>, vector<1x8x32xf32>
      %47 = vector.shape_cast %46 : vector<1x8x32xf32> to vector<8x32xf32>
      %48 = vector.shape_cast %45 : vector<8x32xf32> to vector<1x8x32xf32>
      tpu.vector_store %arg10[%c0_31, %c0_32, %c0_33], %48 {strides = array<i32>} : memref<1x8x32xf32, #tpu.memory_space<vmem>>, vector<1x8x32xf32>,
    } else {
    }
    return
  }
  func.func @transform_0(%arg0: i32, %arg1: i32, %arg2: i32) -> (i32, i32, i32) {
    %c0_i32 = arith.constant 0 : i32
    %c0_i32_0 = arith.constant 0 : i32
    return %arg0, %arg1, %c0_i32 : i32, i32, i32
  }
  func.func @transform_1(%arg0: i32, %arg1: i32, %arg2: i32) -> (i32, i32, i32) {
    %c0_i32 = arith.constant 0 : i32
    %c0_i32_0 = arith.constant 0 : i32
    %c0_i32_1 = arith.constant 0 : i32
    return %arg0, %c0_i32, %c0_i32_0 : i32, i32, i32
  }
  func.func @transform_2(%arg0: i32, %arg1: i32, %arg2: i32) -> (i32, i32, i32) {
    %c0_i32 = arith.constant 0 : i32
    %c0_i32_0 = arith.constant 0 : i32
    %c0_i32_1 = arith.constant 0 : i32
    return %arg0, %c0_i32, %c0_i32_0 : i32, i32, i32
  }
  func.func @transform_3(%arg0: i32, %arg1: i32, %arg2: i32) -> (i32, i32, i32) {
    %c0_i32 = arith.constant 0 : i32
    %c0_i32_0 = arith.constant 0 : i32
    %c0_i32_1 = arith.constant 0 : i32
    return %arg2, %c0_i32, %c0_i32_0 : i32, i32, i32
  }
  func.func @transform_4(%arg0: i32, %arg1: i32, %arg2: i32) -> (i32, i32, i32) {
    %c0_i32 = arith.constant 0 : i32
    %c0_i32_0 = arith.constant 0 : i32
    %c0_i32_1 = arith.constant 0 : i32
    return %arg2, %c0_i32, %c0_i32_0 : i32, i32, i32
  }
  func.func @transform_5(%arg0: i32, %arg1: i32, %arg2: i32) -> (i32, i32, i32) {
    %c0_i32 = arith.constant 0 : i32
    %c0_i32_0 = arith.constant 0 : i32
    %c0_i32_1 = arith.constant 0 : i32
    return %arg2, %c0_i32, %c0_i32_0 : i32, i32, i32
  }
  func.func @transform_6(%arg0: i32, %arg1: i32, %arg2: i32) -> (i32, i32, i32) {
    %c0_i32 = arith.constant 0 : i32
    %c0_i32_0 = arith.constant 0 : i32
    %c0_i32_1 = arith.constant 0 : i32
    return %arg2, %c0_i32, %c0_i32_0 : i32, i32, i32
  }
  func.func @transform_7(%arg0: i32, %arg1: i32, %arg2: i32) -> (i32, i32, i32) {
    %c0_i32 = arith.constant 0 : i32
    %c0_i32_0 = arith.constant 0 : i32
    return %arg0, %arg1, %c0_i32 : i32, i32, i32
  }
  func.func @transform_8(%arg0: i32, %arg1: i32, %arg2: i32) -> (i32, i32, i32, i32) {
    %c0_i32 = arith.constant 0 : i32
    %c0_i32_0 = arith.constant 0 : i32
    return %arg0, %arg2, %arg1, %c0_i32 : i32, i32, i32, i32
  }
}

</mosaic_0001>

<bundles_post_ra>
// kernel: tpu_custom_call.1
= control target key start
LH: loop header
LB: loop body
LE: loop exit
PB: predicated region body
PF: predicated region fallthrough
CT: control target
= control target key end

     0   :  { %s1562_s0 = inlined_call_operand.vmem [shape: f32[2,8,32], index: 0, kind: input, shape index: {}]   ;;  %s1563_s1 = inlined_call_operand.vmem [shape: f32[2,8,32], index: 1, kind: input, shape index: {}]   ;;  %s1564_s2 = inlined_call_operand.vmem [shape: f32[2,8,32], index: 2, kind: input, shape index: {}]   ;;  %s1565_s3 = inlined_call_operand.vmem [shape: bf16[2,32,16], index: 3, kind: input, shape index: {}]   ;;  %s1566_s4 = inlined_call_operand.vmem [shape: bf16[2,32,16], index: 4, kind: input, shape index: {}]   ;;  %s1567_s5 = inlined_call_operand.vmem [shape: bf16[2,32,16], index: 5, kind: input, shape index: {}]   ;;  %s1568_s6 = inlined_call_operand.vmem [shape: bf16[2,16,32], index: 6, kind: input, shape index: {}]   ;;  %s1569_s7 = inlined_call_operand.hbm [shape: f32[2,8,32], index: 7, kind: output, shape index: {0}]   ;;  %s1570_s8 = inlined_call_operand.hbm [shape: f32[2,2,8,8], index: 8, kind: output, shape index: {1}]  }
   0x1   :  { %1590 = sst [smem:[#allocation26_spill]] %s1562_s0 }
   0x2   :  { %1591 = sst [smem:[#allocation27_spill]] %s1563_s1 }
   0x3   :  { %1592 = sst [smem:[#allocation28_spill]] %s1569_s7 }
   0x4   :  { %1593 = sst [smem:[#allocation29_spill]] %s1570_s8 }
   0x5   :  { %14 = vsyncpa [#allocation6], 0 }
   0x6   :  { %16 = vsyncpa [#allocation6 + $0x1], 0 }
   0x7   :  { %17 = vsyncpa [#allocation8], 0 }
   0x8   :  { %19 = vsyncpa [#allocation8 + $0x1], 0  ;;  %s1292_s27 = smov 0   ;;  %s1294_s28 = smov 0  }
   0x9   :  { %s1296_s29 = smov 0   ;;  %s1298_s30 = smov 0  }
   0xa   :  { %s1300_s9 = smov 0   ;;  %s1302_s10 = smov 0  }
   0xb   :  { %s1304_s11 = smov 0   ;;  %s1306_s12 = smov 0  }
   0xc   :  { %s1308_s13 = smov 0   ;;  %s1310_s14 = smov 0  }
   0xd   :  { %s1312_s15 = smov 0  }
   0xe LB: > { %1594 = sst [smem:[#allocation11_spill]] %s1204_s27  ;;  %s913_s16 = sadd.s32 4294967295, %s1244_s15   ;;  %s1244_s15 = sphi %s1312_s15, %s25_s15   ;;  %s1240_s14 = sphi %s1310_s14, %s1638_s14   ;;  %s1236_s13 = sphi %s1308_s13, %s1641_s13   ;;  %s1232_s12 = sphi %s1306_s12, %s1636_s12   ;;  %s1228_s11 = sphi %s1304_s11, %s1635_s11   ;;  %s1224_s10 = sphi %s1302_s10, %s1634_s10   ;;  %s1220_s9 = sphi %s1300_s9, %s1640_s9   ;;  %s1216_s30 = sphi %s1298_s30, %s1639_s30   ;;  %s1212_s29 = sphi %s1296_s29, %s1632_s29   ;;  %s1208_s28 = sphi %s1294_s28, %s1631_s28   ;;  %s1204_s27 = sphi %s1292_s27, %s1630_s27  }
   0xf   : > { %1595 = sst [smem:[#allocation12_spill]] %s1208_s28  ;;  %s914_s17 = sadd.s32 4294967294, %s1244_s15  }
  0x10   : > { %1596 = sst [smem:[#allocation13_spill]] %s1212_s29  ;;  %s37_s18 = sadd.s32 1, %s1236_s13 }
  0x11   : > { %1597 = sst [smem:[#allocation14_spill]] %s1216_s30  ;;  %s44_s19 = sadd.s32 1, %s1240_s14 }
  0x12   : > { %1598 = sst [smem:[#allocation15_spill]] %s1224_s10  ;;  %p38_p0 = scmp.ge.s32.totalorder %s37_s18, 2 }
  0x13   : > { %1599 = sst [smem:[#allocation16_spill]] %s1236_s13  ;;  %s237_s20 = sadd.s32 1, %s1224_s10 }
  0x14   : > { %1600 = sst [smem:[#allocation17_spill]] %s1240_s14  ;;  %p247_p1 = scmp.ne.s32.totalorder %s1224_s10, %s1220_s9 }
  0x15   : > { %1601 = sst [smem:[#allocation18_spill]] %s1244_s15  ;;  %p1354_p2 = scmp.eq.s32.totalorder %s913_s16, 3 }
  0x16   : > { %s1643_s18 = smov (%p38_p0, %s37_s18), 0  ;;  %s1645_s19 = smov (!%p38_p0, %s44_s19), %s1240_s14 }
  0x17   : > { %1603 = sst [smem:[#allocation19_spill]] %s1643_s18  ;;  %p1363_p3 = por %p1354_p2, %p247_p1 }
  0x18   : > { %p253_p4 = scmp.ne.s32.totalorder %s1220_s9, %s1216_s30  ;;  %p46_p5 = scmp.ge.s32.totalorder %s1645_s19, 2 }
  0x19   : > { %p1369_p6 = scmp.eq.s32.totalorder %s914_s17, 3  ;;  %s261_s24 = ssub.s32 %s1236_s13, %s1643_s18 }
  0x1a   : > { %s267_s25 = sadd.s32 1, %s1212_s29  ;;  %s1647_s19 = smov (%p46_p5, %s1645_s19), 0 }
  0x1b   : > { %1606 = sst [smem:[#allocation20_spill]] %s1647_s19  ;;  %p1380_p7 = por %p1369_p6, %p253_p4 }
  0x1c   : > { %p277_p8 = scmp.ne.s32.totalorder %s1212_s29, %s1208_s28  ;;  %s232_s16 = ssub.s32 %s1240_s14, %s1647_s19 }
  0x1d   : > { %s1607_s26 = scalar_select %p1380_p7, 1, 0 }
  0x1e   : > { %p283_p9 = scmp.ne.s32.totalorder %s1208_s28, %s1204_s27  ;;  %p235_p10 = scmp.eq.s32.totalorder %s232_s16, 0 }
  0x1f   : > { %1608 = sst [smem:[#allocation21_spill]] %s1607_s26  ;;  %s262_s17 = sor.u32 %s261_s24, %s232_s16 }
  0x20   : > { %p265_p11 = scmp.eq.s32.totalorder %s262_s17, 0  ;;  %p1392_p12 = por %p277_p8, %p1354_p2 }
  0x21   : > { %s1397_s18 = scalar_select %p235_p10, %s1224_s10, %s237_s20  }
  0x22   : > { %s1609_s30 = scalar_select %p1392_p12, 1, 0 }
  0x23   : > { %1611 = sst [smem:[#allocation23_spill]] %s1397_s18  ;;  %p1404_p13 = por %p283_p9, %p1369_p6 }
  0x24   : > { %1610 = sst [smem:[#allocation22_spill]] %s1609_s30  ;;  %p917_p0 = scmp.ge.s32.totalorder %s1244_s15, 1 }
  0x25   : > { %s1400_s13 = scalar_select %p265_p11, %s1212_s29, %s267_s25  }
  0x26   : > { %s1613_s8 = scalar_select %p1404_p13, 1, 0 }
  0x27   : > { %1612 = sst [smem:[#allocation24_spill]] %s1400_s13  ;;  %p358_p1 = scmp.lt.s32.totalorder %s1244_s15, 5 }
  0x28   : > { %1614 = sst [smem:[#allocation25_spill]] %s1613_s8 }
  0x29   : > { %p359_p4 = pnand %p917_p0, %p358_p1 }
  0x2a   : > { %s1577_s20 = sand.u32 (!%p359_p4), 1, %s1220_s9   ;;  %s1579_s21 = sand.u32 (!%p359_p4), 1, %s1208_s28  }
  0x2b   : > { %362 = sbr.rel (%p359_p4) target bundleno = 908 (0x38c), region = 48  ;;  %s1414_s23 = sshll.u32 (!%p359_p4), %s1577_s20, 3 }
  0x2c   : > { %s1418_s24 = sshll.u32 (!%p359_p4), %s1579_s21, 3  ;;  %p427_p2 = scmp.lt.s32.totalorder (!%p359_p4), %s1232_s12, 1 }
  0x2d   : > { %p442_p5 = scmp.lt.s32.totalorder (!%p359_p4), %s1228_s11, 1  ;;  %s1615_s0 = sld [smem:[#allocation26_spill]] (!%p359_p4) }
  0x2e   : > { %s1616_s1 = sld [smem:[#allocation27_spill]] (!%p359_p4)  ;;  %s419_s21 = scalar_lea.vmem (!%p359_p4), [#allocation5], %s1414_s23 }
  0x2f   : > { %s426_s8 = scalar_lea.vmem (!%p359_p4), [#allocation7], %s1418_s24  ;;  %p931_p6 = scmp.ne.s32.totalorder (!%p359_p4), %s1228_s11, 0 }
  0x30   : > { %s428_s25 = scalar_select %p427_p2, %s1232_s12, 1 }
  0x31   : > { %s443_s16 = scalar_select %p442_p5, %s1228_s11, 1 }
  0x32   : > { %s1424_s17 = sshll.u32 %s428_s25, 3 }
  0x33   : > { %s433_s18 = scalar_lea.vmem %s1615_s0, %s1424_s17  ;;  %s978_s27 = sshll.u32 %s443_s16, 4 }
  0x34   : > { %s437_s13 = scalar_lea.vmem %s1616_s1, %s1424_s17  ;;  %s446_s25 = scalar_lea.vmem %s1565_s3, %s978_s27 }
  0x35   : > { %s451_s14 = scalar_lea.vmem %s1566_s4, %s978_s27  ;;  %s1447_s0 = scalar_lea.vmem %s1567_s5, %s978_s27 }
  0x36   : > { %s981_s10 = sshll.u32 %s443_s16, 3  ;;  %466 = sbr.rel (%p931_p6) target bundleno = 61 (0x3d), region = 52 }
  0x37   : > { %s1452_s29 = scalar_lea.vmem %s1568_s6, %s981_s10 }
  0x3b   : > { %vm467_vm0 = vcmask 261120   ;;  %v1246_v0 = vmov 0.0  }
  0x3c   : > { %468 = vst.msk [vmem:[#allocation2] sm:$0xff] %vm467_vm0, %v1246_v0 }
  0x3d PF: > { %v983_v1 = vld [vmem:[%s451_s14 + $0x8] sm:$0xff]  ;;  %v982_v3 = vld [vmem:[%s451_s14] sm:$0xff]  ;;  %vm493_vm1 = vcmask 261120   ;;  %s950_s1 = sshll.u32 %s1228_s11, 2  ;;  %vm545_vm2 = vcmask 125952   ;;  %vm593_vm3 = vcmask 130048   ;;  %s1617_s30 = scalar_lea.vmem %s1564_s2, %s1424_s17 }
  0x3e   : > { %v987_v2 = vld [vmem:[%s446_s25 + $0x8] sm:$0xff]  ;;  %503 = vmatpush.bf16.msra.mxu0 %v983_v1  ;;  %v986_v4 = vld [vmem:[%s446_s25] sm:$0xff]  ;;  %s544_s7 = scalar_lea.vmem [#allocation3], %s950_s1  ;;  %vm613_vm4 = vcmask 64512   ;;  %vm630_vm5 = vcmask 1043456   ;;  %p970_p8 = scmp.ne.s32.totalorder %s1228_s11, 1 }
  0x3f   : > { %579 = vmatpush.bf16.msra.mxu2 %v987_v2  ;;  %v473_v5 = vld [vmem:[%s437_s13] sm:$0xff]  ;;  %v985_v17 = vld [vmem:[%s1447_s0 + $0x8] sm:$0xff]  ;;  %s549_s13 = scalar_lea.vmem [#allocation4], %s950_s1 }
  0x40   : > { %v551_v6 = vld [vmem:[%s433_s18] sm:$0xff]  ;;  %v474_v7 = vpack.c.bf16 %v473_v5, %v473_v5  ;;  %535 = vmatpush.bf16.msra.mxu1 %v985_v17 }
  0x41   : > { %v552_v8 = vpack.c.bf16 %v551_v6, %v551_v6  ;;  %v984_v18 = vld [vmem:[%s1447_s0] sm:$0xff] }
  0x42   : > { %504 = vmatpush.bf16.msra.mxu0 %v982_v3  ;;  %v475_v19 = vld [vmem:[%s1617_s30] sm:$0xff] }
  0x43   : > { %580 = vmatpush.bf16.msra.mxu2 %v986_v4  ;;  %v476_v20 = vpack.c.bf16 %v475_v19, %v475_v19  ;;  %v988_v34 = vld [vmem:[%s1452_s29] sm:$0xff] }
  0x44   : > { %536 = vmatpush.bf16.msra.mxu1 %v984_v18  ;;  %v647_v42 = vld [vmem:[#allocation2] sm:$0xff] }
  0x45   : > { %940 = vmatmul.msk.bf16.vlgmr.msra.gmra.mxu0 %vm493_vm1, %v474_v7 }
  0x46   : > { %960 = vmatmul.msk.bf16.vlgmr.msra.gmra.mxu2 %vm493_vm1, %v552_v8 }
  0x47   : > { %949 = vmatmul.msk.bf16.vlgmr.msra.gmra.mxu1 %vm493_vm1, %v476_v20 }
  0x48   : > { %667 = vmatpush.bf16.msrb.mxu1 %v988_v34 }
  0xc2   : > { %v506_v9 = vpop.f32.mrf.mxu0 }
  0xc3   : > { %v542_v10 = vpack.c.bf16 %v506_v9, %v506_v9 }
  0xc4   : > { %v538_v24 = vpop.f32.mrf.mxu1 }
  0xc5   : > { %546 = vst.msk [vmem:[%s544_s7] sm:$0xf] %vm545_vm2, %v542_v10  ;;  %v547_v25 = vpack.c.bf16 %v538_v24, %v538_v24 }
  0xc7   : > { %550 = vst.msk [vmem:[%s549_s13] sm:$0xf] %vm545_vm2, %v547_v25 }
  0xc9   : > { %v582_v11 = vpop.f32.mrf.mxu2 }
  0xca   : > { %v508_v12 = vpop.f32.mrf.mxu0  ;;  %v592_v16 = vpack.c.bf16 %v582_v11, %v582_v11 }
  0xcc   : > { %v588_v13 = vld [vmem:[%s544_s7] sm:$0xf]  ;;  %v540_v28 = vpop.f32.mrf.mxu1 }
  0xcd   : > { %v598_v14 = vsel %vm593_vm3, %v588_v13, 0 }
  0xce   : > { %607 = vmatpush.bf16.xpose.msra.mxu3 %v598_v14  ;;  %v591_v30 = vld [vmem:[%s549_s13] sm:$0xf] }
  0xcf   : > { %v632_v31 = vsel %vm630_vm5, %v591_v30, 0 }
  0xd0   : > { %641 = vmatpush.bf16.msrb.mxu0 %v632_v31 }
  0xd1   : > { %v584_v15 = vpop.f32.mrf.mxu2 }
  0xd5   : > { %963 = vmatmul.msk.bf16.vlgmr.msra.gmra.mxu3 %vm593_vm3, %v592_v16 }
 0x158   : > { %v609_v21 = vpop.f32.mrf.mxu3 }
 0x159   : > { %v614_v22 = vsel %vm613_vm4, %v609_v21, -inf }
 0x15a   : > { %615 = vmax.xlane.f32.xlu0 %v614_v22 }
 0x160   : > { %v611_v23 = vpop.f32.mrf.mxu3 }
 0x1cd   : > { %v616_v26 = vpop.xlane.xlu0 %615 }
 0x1ce   : > { %v617_v27 = vsub.f32 %v609_v21, %v616_v26 }
 0x1d0   : > { %v618_v29 = vmul.f32 1.442695, %v617_v27 }
 0x1d2   : > { %1090 = vpow2.f32 %v618_v29 }
 0x1d8   : > { %v1091_v32 = vpop.eup %1090 }
 0x1d9   : > { %v620_v33 = vsel %vm613_vm4, %v1091_v32, 0.0 }
 0x1da   : > { %621 = vadd.xlane.f32.xlu0 %v620_v33 }
 0x24d   : > { %v622_v35 = vpop.xlane.xlu0 %621 }
 0x24e   : > { %1092 = vrcp.f32 %v622_v35 }
 0x254   : > { %v1093_v36 = vpop.eup %1092 }
 0x255   : > { %v624_v37 = vmul.f32 %v1093_v36, %v1091_v32 }
 0x257   : > { %625 = vst.msk [vmem:[%s426_s8] sm:$0xff] %vm613_vm4, %v624_v37  ;;  %v626_v38 = vpack.c.bf16 %v624_v37, %v624_v37 }
 0x259   : > { %964 = vmatmul.msk.bf16.vlgmr.msrb.gmra.mxu0 %vm613_vm4, %v626_v38 }
 0x2d6   : > { %v643_v39 = vpop.f32.mrf.mxu0 }
 0x2d7   : > { %v648_v40 = vpack.c.bf16 %v643_v39, %v643_v39 }
 0x2d9   : > { %969 = vmatmul.msk.bf16.vlgmr.msrb.gmra.mxu1 %vm593_vm3, %v648_v40 }
 0x2de   : > { %v645_v41 = vpop.f32.mrf.mxu0 }
 0x356   : > { %v669_v43 = vpop.f32.mrf.mxu1 }
 0x357   : > { %v673_v44 = vadd.f32 %v669_v43, %v647_v42 }
 0x359   : > { %674 = vst.msk [vmem:[#allocation2] sm:$0xff] %vm493_vm1, %v673_v44 }
 0x35a   : > { %678 = sbr.rel (%p970_p8) target bundleno = 866 (0x362), region = 60 }
 0x35e   : > { %v671_v45 = vpop.f32.mrf.mxu1 }
 0x360   : > { %v679_v46 = vld [vmem:[#allocation2] sm:$0xff] }
 0x361   : > { %680 = vst.msk [vmem:[%s419_s21] sm:$0xff] %vm493_vm1, %v679_v46 }
 0x362 PF: > { %s973_s0 = sshll.u32 %s1232_s12, 3  ;;  %s1618_s26 = sld [smem:[#allocation28_spill]] }
 0x363   : > { %s700_s17 = sshll.u32 %s419_s21, 4  ;;  %s1619_s14 = sand.u32 1, %s1220_s9   ;;  %s701_s17 = int_to_ptr.vmem [resolvable:$true] %s700_s17 }
 0x364   : > { %s682_s19 = scalar_lea.sflag [#allocation6], %s1619_s14 }
 0x368   : > { %s698_s16 = scalar_lea.hbm %s1618_s26, %s973_s0  ;;  %s1114_s7 = scalar_lea.hbm %s1618_s26, 16 }
 0x369   : > { %s702_s25 = sshll.u32 %s698_s16, 4  ;;  %s703_s25 = int_to_ptr.hbm [resolvable:$true] %s702_s25 }
 0x36a   : > { %s1108_s10 = sshra.s32 %s703_s25, 4  ;;  %s1109_s10 = int_to_ptr.hbm [resolvable:$true] %s1108_s10 }
 0x36b   : > { %s1110_s20 = scalar_lea.hbm %s1109_s10, 8  ;;  %p1115_p0 = scmp.lt.s32.totalorder %s1109_s10, %s1618_s26 }
 0x36c   : > { %p1111_p9 = scmp.ne.s32.totalorder %s1109_s10, %s1110_s20  ;;  %p1116_p1 = scmp.lt.s32.totalorder %s1114_s7, %s1110_s20 }
 0x36e   : > { %p1112_p10 = pnand %p1111_p9, %p1363_p3  ;;  %p1117_p4 = por %p1116_p1, %p1115_p0 }
 0x370   : > { %p1113_p11 = pneg %p1112_p10 }
 0x372   : > { %p1118_p2 = pnand %p1117_p4, %p1113_p11 }
 0x374   : > { %1121 = shalt.err (!%p1118_p2)
}
 0x375   : > { %s1620_s23 = sld [smem:[#allocation12_spill]]  ;;  %s974_s30 = sshll.u32 %s1232_s12, 1 }
 0x376   : > { %989 = dma.vmem_to_hbm [thread:$0]  (%p1363_p3), %s701_s17, 128, %s703_s25, %s682_s19  }
 0x377   : > { %s717_s13 = sshll.u32 %s426_s8, 4  ;;  %s713_s0 = sadd.s32 %s1228_s11, %s974_s30  ;;  %s718_s13 = int_to_ptr.vmem [resolvable:$true] %s717_s13 }
 0x378   : > { %s975_s15 = sshll.u32 %s713_s0, 3  ;;  %s1622_s14 = sld [smem:[#allocation29_spill]] }
 0x37b   : > { %s1624_s29 = sand.u32 1, %s1620_s23  }
 0x37c   : > { %s687_s22 = scalar_lea.sflag [#allocation8], %s1624_s29 }
 0x37e   : > { %s1623_s1 = smov %s1622_s14  ;;  %s715_s10 = scalar_lea.hbm %s1622_s14, %s975_s15 }
 0x37f   : > { %s719_s20 = sshll.u32 %s715_s10, 4  ;;  %s1142_s11 = scalar_lea.hbm %s1623_s1, 32  ;;  %s720_s20 = int_to_ptr.hbm [resolvable:$true] %s719_s20 }
 0x380   : > { %s1136_s7 = sshra.s32 %s720_s20, 4  ;;  %s1137_s7 = int_to_ptr.hbm [resolvable:$true] %s1136_s7 }
 0x381   : > { %s1138_s27 = scalar_lea.hbm %s1137_s7, 8  ;;  %p1143_p8 = scmp.lt.s32.totalorder %s1137_s7, %s1623_s1 }
 0x382   : > { %p1139_p5 = scmp.ne.s32.totalorder %s1137_s7, %s1138_s27  ;;  %p1144_p9 = scmp.lt.s32.totalorder %s1142_s11, %s1138_s27 }
 0x384   : > { %p1140_p3 = pnand %p1139_p5, %p1392_p12  ;;  %p1145_p10 = por %p1144_p9, %p1143_p8 }
 0x386   : > { %p1141_p6 = pneg %p1140_p3 }
 0x388   : > { %p1146_p11 = pnand %p1145_p10, %p1141_p6 }
 0x38a   : > { %1149 = shalt.err (!%p1146_p11)
}
 0x38b   : > { %990 = dma.vmem_to_hbm [thread:$0]  (%p1392_p12), %s718_s13, 128, %s720_s20, %s687_s22  }
 0x38c PF: > { %s1625_s25 = sld [smem:[#allocation18_spill]] }
 0x38d   : > { %s1626_s19 = sld [smem:[#allocation14_spill]] }
 0x392   : > { %p1000_p0 = scmp.ge.s32.totalorder %s1625_s25, 2 }
 0x393   : > { %s731_s23 = sand.u32 1, %s1626_s19  }
 0x394   : > { %p994_p1 = pnand %p1000_p0, %p1380_p7  ;;  %s732_s30 = scalar_lea.sflag [#allocation6], %s731_s23 }
 0x396   : > { %p995_p4 = pneg %p994_p1 }
 0x398   : > { %1195 = dma.done.wait (%p995_p4), %s732_s30, 128  }
 0x399   : > { %1197 = vsyncadd (%p995_p4), %s732_s30, 4294967168  ;;  %s1628_s0 = sld [smem:[#allocation11_spill]]  ;;  %p997_p2 = pnand %p1000_p0, %p1404_p13 }
 0x39b   : > { %p998_p5 = pneg %p997_p2 }
 0x39f   : > { %s741_s18 = sand.u32 1, %s1628_s0  }
 0x3a0   : > { %s742_s21 = scalar_lea.sflag [#allocation8], %s741_s18 }
 0x3a1   : > { %1199 = dma.done.wait (%p998_p5), %s742_s21, 128  }
 0x3a2   : > { %1201 = vsyncadd (%p998_p5), %s742_s21, 4294967168  ;;  %s25_s15 = sadd.s32 1, %s1625_s25   ;;  %s1630_s27 = sld [smem:[#allocation12_spill]] }
 0x3a3   : > { %p22_p12 = scmp.ge.s32.totalorder %s25_s15, 6   ;;  %s1631_s28 = sld [smem:[#allocation13_spill]] }
 0x3a4   : > { %s1632_s29 = sld [smem:[#allocation24_spill]]  ;;  %s1639_s30 = smov %s1220_s9 }
 0x3a5   : > { %s1633_s13 = sld [smem:[#allocation15_spill]] }
 0x3a6   : > { %s1634_s10 = sld [smem:[#allocation23_spill]] }
 0x3a7   : > { %s1635_s11 = sld [smem:[#allocation16_spill]] }
 0x3a8   : > { %s1636_s12 = sld [smem:[#allocation17_spill]] }
 0x3a9   : > { %s1637_s16 = sld [smem:[#allocation19_spill]] }
 0x3aa   : > { %s1638_s14 = sld [smem:[#allocation20_spill]] }
 0x3ab   : > { %s1640_s9 = smov %s1633_s13  ;;  %24 = sbr.rel (!%p22_p12) target bundleno = 14 (0xe), region = 134 }
 0x3af   : > { %s1641_s13 = smov %s1637_s16 }
 0x3b0   :  { %748 = vsyncpa [#allocation6], 1 }
 0x3b1   :  { %750 = vsyncpa [#allocation6 + $0x1], 1 }
 0x3b2   :  { %751 = vsyncpa [#allocation8], 1 }
 0x3b3   :  { %753 = vsyncpa [#allocation8 + $0x1], 1 }

</bundles_post_ra>
